<compile_context>
chip_gen: v6e
topology: v6e:2x2x1
jax: 0.10.0
libtpu: 0.0.40
codegen_flags: <defaults>
</compile_context>

<pallas_src>
import functools

import jax
import jax.numpy as jnp
from jax.experimental import pallas as pl
from jax.experimental.pallas import tpu as pltpu

_LANES = 128  # TPU vreg lane width


def _hier_attn_kernel(x_ref, wT_ref, b_ref, u_ref, o_ref, *, bb, t, p, h):
    # x_ref : (bb, t, p*h)   bb packed-batch rows, p batch elements per row
    # wT_ref: (p*h, p*h)     block-diagonal W^T (p copies of the (h,h) weight)
    # b_ref : (1, p*h)       bias, tiled p times along lanes
    # u_ref : (1, p*h)       u_w weight, tiled p times along lanes
    # o_ref : (bb, p*h)      lane-packed outputs s_i
    l = p * h
    x3 = x_ref[...]                                     # (bb, t, l)
    x2 = x3.reshape(bb * t, l)                          # leading-dim merge only

    # u_it = tanh(x @ W^T + b): one lane-dense MXU matmul over all bb*t rows.
    u_it = jnp.tanh(
        jnp.dot(x2, wT_ref[...], preferred_element_type=jnp.float32)
        + b_ref[...]                                    # (1, l) broadcasts
    )                                                   # (bb*t, l) f32

    # logits = u_it . u per packed element: VPU multiply + per-group lane
    # reduce (no degenerate N=1 MXU matmul).
    prod = u_it * u_ref[...]                            # (bb*t, l)
    if p > 1:
        logits = jnp.concatenate(
            [jnp.sum(prod[:, j * h:(j + 1) * h], axis=-1, keepdims=True)
             for j in range(p)],
            axis=-1)                                    # (bb*t, p)
    else:
        logits = jnp.sum(prod, axis=-1, keepdims=True)  # (bb*t, 1)
    logits = logits.reshape(bb, t, p)                   # lane dim preserved

    # Softmax over the sequence axis (torch dim=1), independent per
    # (packed row, pack slot).
    m = jnp.max(logits, axis=1, keepdims=True)          # (bb, 1, p)
    e = jnp.exp(logits - m)                             # (bb, t, p)
    denom = jnp.sum(e, axis=1, keepdims=True)           # (bb, 1, p)
    # EUP vrcp (co-issued, effectively free); ~1e-4 relative error on the
    # normalization factor only.
    a = e * pl.reciprocal(denom, approx=True)           # (bb, t, p)

    # s_i = sum_t a_t * x_t: VPU multiply + sublane (t) reduce per lane group.
    # The multiply promotes x3 lazily (no materialized f32 copy for bf16 x).
    if p > 1:
        s = jnp.concatenate(
            [jnp.sum(a[:, :, j:j + 1] * x3[:, :, j * h:(j + 1) * h], axis=1)
             for j in range(p)],
            axis=-1)                                    # (bb, l)
    else:
        s = jnp.sum(a * x3, axis=1)                     # (bb, l)

    o_ref[...] = s.astype(o_ref.dtype)


def _round_up(v, m):
    return ((v + m - 1) // m) * m


def _tensorcores_per_chip():
    # v7x has 2 TensorCores per chip (the "parallel" grid axis shards across
    # them); v5e / v6e have 1, so splitting a mem-bound grid there is pure
    # per-step overhead.
    try:
        kind = jax.devices()[0].device_kind.lower()
    except Exception:
        return 1
    return 2 if "v7" in kind else 1


def hierarchical_attention(x, w, b, u, *, block_rows=None,
                           target_block_bytes=2 << 20):
    """
    x: (B, T, H)  input
    w: (H, H)     w_linear.weight  (torch layout: out x in)
    b: (H,)       w_linear.bias
    u: (1, H)     u_w.weight       (torch layout: out x in, no bias)
    returns s_i: (B, H)
    """
    B, T, H = x.shape
    itemsize = jnp.dtype(x.dtype).itemsize

    # ---- lane packing: P batch elements share the 128-lane axis ----------
    if H < _LANES and _LANES % H == 0:
        P = _LANES // H
    else:
        P = 1                       # H already lane-dense (or not divisible)
    L = P * H

    rows_total = pl.cdiv(B, P)      # packed-batch rows before block padding
    row_bytes = T * L * itemsize    # bytes of one packed x row
    num_tc = _tensorcores_per_chip()

    # ---- block sizing: DMA / per-step-overhead amortization --------------
    if block_rows is None:
        block_rows = max(8, int(target_block_bytes // max(row_bytes, 1)))
        if num_tc > 1 and rows_total > 8:
            # v7x: keep >= num_tc grid steps (split the already-large block).
            block_rows = min(block_rows, pl.cdiv(rows_total, num_tc))
    # (8,128) rule: block sublane dim must be a multiple of 8 OR the full
    # (packed) array extent.  Tiny batches take the full extent (no over-pad).
    if block_rows >= rows_total:
        block_rows = rows_total
    else:
        block_rows = _round_up(max(int(block_rows), 1), 8)

    grid_rows = pl.cdiv(rows_total, block_rows)
    rows_pad = grid_rows * block_rows
    B_pad = rows_pad * P

    if B_pad != B:
        # Zero padding is benign: padded rows see uniform attention over a
        # zero input and produce zeros, sliced off below.  Each pack slot's
        # softmax is independent, so real rows are unaffected.
        x = jnp.pad(x, ((0, B_pad - B), (0, 0), (0, 0)))

    # ---- wrapper-side layout plumbing (pure XLA, outside the kernel) -----
    # (B_pad, T, H) -> (rows_pad, T, P*H): P batch elements per lane row.
    xp = (x.reshape(rows_pad, P, T, H)
           .transpose(0, 2, 1, 3)
           .reshape(rows_pad, T, L))

    wT = jnp.asarray(w).T                                   # (H, H) == W^T
    if P > 1:
        wT_bd = jnp.kron(jnp.eye(P, dtype=wT.dtype), wT)    # (L, L) block-diag
    else:
        wT_bd = wT
    b_bd = jnp.tile(jnp.asarray(b).reshape(1, H), (1, P))   # (1, L)
    u_bd = jnp.tile(jnp.asarray(u).reshape(1, H), (1, P))   # (1, L)

    kernel = functools.partial(_hier_attn_kernel, bb=block_rows, t=T, p=P, h=H)

    # VMEM budget: 2 buffers for the x block + 2 for the out block + the
    # replicated weights.  Only raise the scoped-VMEM limit when the default
    # (16 MiB on v5e) could be tight; keep headroom vs v7x's 64 MiB physical.
    x_block_bytes = block_rows * T * L * itemsize
    out_block_bytes = block_rows * L * itemsize
    const_bytes = (L * L + 2 * L) * itemsize
    vmem_need = 2 * (x_block_bytes + out_block_bytes + const_bytes)
    compiler_kwargs = dict(dimension_semantics=("parallel",))
    if vmem_need > (12 << 20):
        compiler_kwargs["vmem_limit_bytes"] = int(min(2 * vmem_need, 40 << 20))

    out = pl.pallas_call(
        kernel,
        out_shape=jax.ShapeDtypeStruct((rows_pad, L), x.dtype),
        grid_spec=pltpu.PrefetchScalarGridSpec(
            num_scalar_prefetch=0,
            grid=(grid_rows,),
            in_specs=[
                # x block: the only large, grid-varying operand.  (On v7x with
                # big blocks, pipeline_mode=pl.Buffered(3) can hide DMA issue
                # latency; left at the default depth here.)
                pl.BlockSpec((block_rows, T, L), lambda i: (i, 0, 0)),
                # Constant-index replicated operands (64 KiB total at L=128).
                # For large H, single-buffer via pipeline_mode=pl.Buffered(1).
                pl.BlockSpec((L, L), lambda i: (0, 0)),   # block-diag W^T
                pl.BlockSpec((1, L), lambda i: (0, 0)),   # bias (tiled)
                pl.BlockSpec((1, L), lambda i: (0, 0)),   # u row (tiled)
            ],
            out_specs=pl.BlockSpec((block_rows, L), lambda i: (i, 0)),
        ),
        compiler_params=pltpu.CompilerParams(**compiler_kwargs),
    )(xp, wT_bd, b_bd, u_bd)

    # Unpack lanes back to (B, H).
    s = out.reshape(rows_pad, P, H).reshape(B_pad, H)
    return s[:B]


def hierarchical_attention_ref(x, w, b, u):
    """Plain-JAX reference mirroring the PyTorch module."""
    u_it = jnp.tanh(jnp.einsum("bth,oh->bto", x, w) + b)          # (B,T,H)
    logits = jnp.einsum("bth,oh->bto", u_it, u)                   # (B,T,1)
    a_it = jax.nn.softmax(logits, axis=1)                         # (B,T,1)
    return jnp.sum(x * a_it, axis=1)                              # (B,H)


if __name__ == "__main__":
    B, T, H = 2, 8, 32   # small shapes consistent with the module's forward

    key = jax.random.PRNGKey(0)
    kx, kw, kb, ku = jax.random.split(key, 4)

    x = jax.random.normal(kx, (B, T, H), dtype=jnp.float32)
    # deterministic synthetic params (nn.Linear(H,H), nn.Linear(H,1,bias=False))
    w = jax.random.normal(kw, (H, H), dtype=jnp.float32) * 0.1    # w_linear.weight
    b = jax.random.normal(kb, (H,), dtype=jnp.float32) * 0.1      # w_linear.bias
    u = jax.random.normal(ku, (1, H), dtype=jnp.float32) * 0.1    # u_w.weight

    out = hierarchical_attention(x, w, b, u)
    out = jax.block_until_ready(out)

    ref = hierarchical_attention_ref(x, w, b, u)
    assert out.shape == (B, H)
    # approx=True reciprocal (EUP vrcp) bounds the error to ~1e-4 relative on
    # the softmax normalization; everything else is f32-exact.
    assert jnp.allclose(out, ref, atol=2e-3, rtol=2e-3), "mismatch vs reference"

    print("KERNEL_OK")
</pallas_src>

<mosaic_0001>
module attributes {stable_mosaic.version = 11 : i64} {
  func.func @_hier_attn_kernel(%arg0: i32, %arg1: memref<1x8x128xf32, #tpu.memory_space<vmem>>, %arg2: memref<128x128xf32, #tpu.memory_space<vmem>>, %arg3: memref<1x128xf32, #tpu.memory_space<vmem>>, %arg4: memref<1x128xf32, #tpu.memory_space<vmem>>, %arg5: memref<1x128xf32, #tpu.memory_space<vmem>>) attributes {dimension_semantics = [#tpu.dimension_semantics<parallel>], iteration_bounds = array<i64: 1>, scalar_prefetch = 0 : i64, scratch_operands = 0 : i64, tpu.core_type = #tpu.core_type<tc>, window_params = [{transform_indices = @transform_0, window_bounds = array<i64: 1, 8, 128>}, {pipeline_mode = #tpu.pipeline_mode<synchronous>, transform_indices = @transform_1, window_bounds = array<i64: 128, 128>}, {pipeline_mode = #tpu.pipeline_mode<synchronous>, transform_indices = @transform_2, window_bounds = array<i64: 1, 128>}, {pipeline_mode = #tpu.pipeline_mode<synchronous>, transform_indices = @transform_3, window_bounds = array<i64: 1, 128>}, {transform_indices = @transform_4, window_bounds = array<i64: 1, 128>}]} {
    %c0 = arith.constant 0 : index
    %c0_0 = arith.constant 0 : index
    %c0_1 = arith.constant 0 : index
    %0 = vector.load %arg1[%c0, %c0_0, %c0_1] : memref<1x8x128xf32, #tpu.memory_space<vmem>>, vector<1x8x128xf32>
    %1 = vector.shape_cast %0 : vector<1x8x128xf32> to vector<8x128xf32>
    %c0_2 = arith.constant 0 : index
    %c0_3 = arith.constant 0 : index
    %2 = vector.load %arg2[%c0_2, %c0_3] : memref<128x128xf32, #tpu.memory_space<vmem>>, vector<128x128xf32>
    %cst = arith.constant dense<0.000000e+00> : vector<8x128xf32>
    %3 = tpu.matmul %1, %2, %cst {dimension_numbers = #tpu.dot_dimension_numbers<[1], [0], [0], [1], [0, 0, 1, 1], [], []>} : vector<8x128xf32>, vector<128x128xf32>, vector<8x128xf32> -> vector<8x128xf32>
    %c0_4 = arith.constant 0 : index
    %c0_5 = arith.constant 0 : index
    %4 = vector.load %arg3[%c0_4, %c0_5] : memref<1x128xf32, #tpu.memory_space<vmem>>, vector<1x128xf32>
    %5 = vector.broadcast %4 : vector<1x128xf32> to vector<8x128xf32>
    %6 = arith.addf %3, %5 : vector<8x128xf32>
    %7 = math.tanh %6 : vector<8x128xf32>
    %c0_6 = arith.constant 0 : index
    %c0_7 = arith.constant 0 : index
    %8 = vector.load %arg4[%c0_6, %c0_7] : memref<1x128xf32, #tpu.memory_space<vmem>>, vector<1x128xf32>
    %9 = vector.broadcast %8 : vector<1x128xf32> to vector<8x128xf32>
    %10 = arith.mulf %7, %9 : vector<8x128xf32>
    %11 = vector.extract_strided_slice %10 {offsets = [0, 0], sizes = [8, 32], strides = [1, 1]} : vector<8x128xf32> to vector<8x32xf32>
    %cst_8 = arith.constant dense<0.000000e+00> : vector<8xf32>
    %12 = vector.multi_reduction <add>, %11, %cst_8 [1] : vector<8x32xf32> to vector<8xf32>
    %13 = vector.shape_cast %12 : vector<8xf32> to vector<8x1xf32>
    %14 = vector.extract_strided_slice %10 {offsets = [0, 32], sizes = [8, 32], strides = [1, 1]} : vector<8x128xf32> to vector<8x32xf32>
    %cst_9 = arith.constant dense<0.000000e+00> : vector<8xf32>
    %15 = vector.multi_reduction <add>, %14, %cst_9 [1] : vector<8x32xf32> to vector<8xf32>
    %16 = vector.shape_cast %15 : vector<8xf32> to vector<8x1xf32>
    %17 = vector.extract_strided_slice %10 {offsets = [0, 64], sizes = [8, 32], strides = [1, 1]} : vector<8x128xf32> to vector<8x32xf32>
    %cst_10 = arith.constant dense<0.000000e+00> : vector<8xf32>
    %18 = vector.multi_reduction <add>, %17, %cst_10 [1] : vector<8x32xf32> to vector<8xf32>
    %19 = vector.shape_cast %18 : vector<8xf32> to vector<8x1xf32>
    %20 = vector.extract_strided_slice %10 {offsets = [0, 96], sizes = [8, 32], strides = [1, 1]} : vector<8x128xf32> to vector<8x32xf32>
    %cst_11 = arith.constant dense<0.000000e+00> : vector<8xf32>
    %21 = vector.multi_reduction <add>, %20, %cst_11 [1] : vector<8x32xf32> to vector<8xf32>
    %22 = vector.shape_cast %21 : vector<8xf32> to vector<8x1xf32>
    %23 = tpu.concatenate %13, %16, %19, %22 in 1 : vector<8x1xf32>, vector<8x1xf32>, vector<8x1xf32>, vector<8x1xf32> -> vector<8x4xf32>
    %24 = vector.shape_cast %23 : vector<8x4xf32> to vector<1x8x4xf32>
    %cst_12 = arith.constant dense<0xFF800000> : vector<1x4xf32>
    %25 = vector.multi_reduction <maximumf>, %24, %cst_12 [1] : vector<1x8x4xf32> to vector<1x4xf32>
    %26 = vector.shape_cast %25 : vector<1x4xf32> to vector<1x1x4xf32>
    %27 = vector.broadcast %26 : vector<1x1x4xf32> to vector<1x8x4xf32>
    %28 = arith.subf %24, %27 : vector<1x8x4xf32>
    %29 = math.exp %28 : vector<1x8x4xf32>
    %cst_13 = arith.constant dense<0.000000e+00> : vector<1x4xf32>
    %30 = vector.multi_reduction <add>, %29, %cst_13 [1] : vector<1x8x4xf32> to vector<1x4xf32>
    %31 = vector.shape_cast %30 : vector<1x4xf32> to vector<1x1x4xf32>
    %32 = tpu.reciprocal %31 {approx = true} : vector<1x1x4xf32> -> vector<1x1x4xf32>
    %33 = vector.broadcast %32 : vector<1x1x4xf32> to vector<1x8x4xf32>
    %34 = arith.mulf %29, %33 : vector<1x8x4xf32>
    %35 = vector.extract_strided_slice %34 {offsets = [0, 0, 0], sizes = [1, 8, 1], strides = [1, 1, 1]} : vector<1x8x4xf32> to vector<1x8x1xf32>
    %36 = vector.extract_strided_slice %0 {offsets = [0, 0, 0], sizes = [1, 8, 32], strides = [1, 1, 1]} : vector<1x8x128xf32> to vector<1x8x32xf32>
    %37 = vector.broadcast %35 : vector<1x8x1xf32> to vector<1x8x32xf32>
    %38 = arith.mulf %37, %36 : vector<1x8x32xf32>
    %cst_14 = arith.constant dense<0.000000e+00> : vector<1x32xf32>
    %39 = vector.multi_reduction <add>, %38, %cst_14 [1] : vector<1x8x32xf32> to vector<1x32xf32>
    %40 = vector.extract_strided_slice %34 {offsets = [0, 0, 1], sizes = [1, 8, 1], strides = [1, 1, 1]} : vector<1x8x4xf32> to vector<1x8x1xf32>
    %41 = vector.extract_strided_slice %0 {offsets = [0, 0, 32], sizes = [1, 8, 32], strides = [1, 1, 1]} : vector<1x8x128xf32> to vector<1x8x32xf32>
    %42 = vector.broadcast %40 : vector<1x8x1xf32> to vector<1x8x32xf32>
    %43 = arith.mulf %42, %41 : vector<1x8x32xf32>
    %cst_15 = arith.constant dense<0.000000e+00> : vector<1x32xf32>
    %44 = vector.multi_reduction <add>, %43, %cst_15 [1] : vector<1x8x32xf32> to vector<1x32xf32>
    %45 = vector.extract_strided_slice %34 {offsets = [0, 0, 2], sizes = [1, 8, 1], strides = [1, 1, 1]} : vector<1x8x4xf32> to vector<1x8x1xf32>
    %46 = vector.extract_strided_slice %0 {offsets = [0, 0, 64], sizes = [1, 8, 32], strides = [1, 1, 1]} : vector<1x8x128xf32> to vector<1x8x32xf32>
    %47 = vector.broadcast %45 : vector<1x8x1xf32> to vector<1x8x32xf32>
    %48 = arith.mulf %47, %46 : vector<1x8x32xf32>
    %cst_16 = arith.constant dense<0.000000e+00> : vector<1x32xf32>
    %49 = vector.multi_reduction <add>, %48, %cst_16 [1] : vector<1x8x32xf32> to vector<1x32xf32>
    %50 = vector.extract_strided_slice %34 {offsets = [0, 0, 3], sizes = [1, 8, 1], strides = [1, 1, 1]} : vector<1x8x4xf32> to vector<1x8x1xf32>
    %51 = vector.extract_strided_slice %0 {offsets = [0, 0, 96], sizes = [1, 8, 32], strides = [1, 1, 1]} : vector<1x8x128xf32> to vector<1x8x32xf32>
    %52 = vector.broadcast %50 : vector<1x8x1xf32> to vector<1x8x32xf32>
    %53 = arith.mulf %52, %51 : vector<1x8x32xf32>
    %cst_17 = arith.constant dense<0.000000e+00> : vector<1x32xf32>
    %54 = vector.multi_reduction <add>, %53, %cst_17 [1] : vector<1x8x32xf32> to vector<1x32xf32>
    %55 = tpu.concatenate %39, %44, %49, %54 in 1 : vector<1x32xf32>, vector<1x32xf32>, vector<1x32xf32>, vector<1x32xf32> -> vector<1x128xf32>
    %c0_18 = arith.constant 0 : index
    %c0_19 = arith.constant 0 : index
    %56 = vector.load %arg5[%c0_18, %c0_19] : memref<1x128xf32, #tpu.memory_space<vmem>>, vector<1x128xf32>
    tpu.vector_store %arg5[%c0_18, %c0_19], %55 {strides = array<i32>} : memref<1x128xf32, #tpu.memory_space<vmem>>, vector<1x128xf32>,
    return
  }
  func.func @transform_0(%arg0: i32) -> (i32, i32, i32) {
    %c0_i32 = arith.constant 0 : i32
    %c0_i32_0 = arith.constant 0 : i32
    %c0_i32_1 = arith.constant 0 : i32
    return %arg0, %c0_i32, %c0_i32_0 : i32, i32, i32
  }
  func.func @transform_1(%arg0: i32) -> (i32, i32) {
    %c0_i32 = arith.constant 0 : i32
    %c0_i32_0 = arith.constant 0 : i32
    %c0_i32_1 = arith.constant 0 : i32
    return %c0_i32, %c0_i32_0 : i32, i32
  }
  func.func @transform_2(%arg0: i32) -> (i32, i32) {
    %c0_i32 = arith.constant 0 : i32
    %c0_i32_0 = arith.constant 0 : i32
    %c0_i32_1 = arith.constant 0 : i32
    return %c0_i32, %c0_i32_0 : i32, i32
  }
  func.func @transform_3(%arg0: i32) -> (i32, i32) {
    %c0_i32 = arith.constant 0 : i32
    %c0_i32_0 = arith.constant 0 : i32
    %c0_i32_1 = arith.constant 0 : i32
    return %c0_i32, %c0_i32_0 : i32, i32
  }
  func.func @transform_4(%arg0: i32) -> (i32, i32) {
    %c0_i32 = arith.constant 0 : i32
    %c0_i32_0 = arith.constant 0 : i32
    return %arg0, %c0_i32 : i32, i32
  }
}

</mosaic_0001>

<bundles_post_ra>
// kernel: tpu_custom_call.1
= control target key start
LH: loop header
LB: loop body
LE: loop exit
PB: predicated region body
PF: predicated region fallthrough
CT: control target
= control target key end

     0   :  { %9 = vsyncpa [#allocation3], 0  ;;  %s484_s0 = inlined_call_operand.hbm [shape: f32[1,8,128], index: 0, kind: input, shape index: {}]   ;;  %s485_s1 = inlined_call_operand.hbm [shape: f32[128,128], index: 1, kind: input, shape index: {}]   ;;  %s486_s2 = inlined_call_operand.vmem [shape: f32[1,128], index: 2, kind: input, shape index: {}]   ;;  %s487_s3 = inlined_call_operand.vmem [shape: f32[1,128], index: 3, kind: input, shape index: {}]   ;;  %s488_s4 = inlined_call_operand.hbm [shape: f32[1,128], index: 4, kind: output, shape index: {}]  }
   0x1   :  { %10 = vsyncpa [#allocation6], 0 }
   0x2   :  { %11 = vsyncpa [#allocation4], 0  ;;  %s415_s15 = smov [#allocation2]   ;;  %s416_s17 = smov [#allocation5]  }
   0x3   :  { %s18_s16 = sshll.u32 %s415_s15, 4  ;;  %s27_s18 = sshll.u32 %s416_s17, 4  ;;  %s19_s16 = int_to_ptr.vmem [resolvable:$true] %s18_s16  ;;  %s28_s18 = int_to_ptr.vmem [resolvable:$true] %s27_s18 }
   0x4   :  { %s357_s19 = scalar_lea.vmem %s19_s16, 128  ;;  %p362_p1 = scmp.lt.s32.totalorder %s19_s16, %s19_s16 }
   0x5   :  { %p358_p0 = scmp.ne.s32.totalorder %s19_s16, %s357_s19  ;;  %p363_p2 = scmp.lt.s32.totalorder %s357_s19, %s357_s19 }
   0x7   :  { %p364_p3 = por %p363_p2, %p362_p1 }
   0x9   :  { %p365_p4 = pnand %p364_p3, %p358_p0 }
   0xb   :  { %368 = shalt.err (!%p365_p4)
}
   0xc   :  { %21 = dma.hbm_to_vmem [thread:$0]  %s484_s0, 128, %s19_s16, [#allocation3]  }
   0xd   :  { %s377_s22 = scalar_lea.vmem %s28_s18, 2048  ;;  %p382_p6 = scmp.lt.s32.totalorder %s28_s18, %s28_s18 }
   0xe   :  { %p378_p5 = scmp.ne.s32.totalorder %s28_s18, %s377_s22  ;;  %p383_p7 = scmp.lt.s32.totalorder %s377_s22, %s377_s22 }
  0x10   :  { %p384_p8 = por %p383_p7, %p382_p6 }
  0x12   :  { %p385_p9 = pnand %p384_p8, %p378_p5 }
  0x14   :  { %388 = shalt.err (!%p385_p9)
}
  0x15   :  { %s417_s23 = smov 128   ;;  %s418_s24 = smov 8  }
  0x16   :  { %33 = dma.hbm_to_vmem [thread:$0]  %s485_s1, 2048, %s28_s18, [#allocation6], %s417_s23, %s417_s23, %s418_s24  }
  0x17   :  { %409 = dma.done.wait [#allocation3], 128  }
  0x18   :  { %410 = vsyncadd [#allocation3], 4294967168 }
  0x19   :  { %411 = dma.done.wait [#allocation6], 2048  }
  0x1a   :  { %412 = vsyncadd [#allocation6], 4294965248  ;;  %v419_v0 = vmov 0.0   ;;  %vm420_vm0 = vmmov 0   ;;  %v60_v1 = vld [vmem:[#allocation5 + $0x78] sm:$0xff]  ;;  %v59_v2 = vld [vmem:[#allocation5 + $0x70] sm:$0xff] }
  0x1b   :  { %289 = vmatprep.subr.mxu0 %v419_v0  ;;  %321 = vmatprep.mubr.msk.f32.mxu0 %vm420_vm0, %v419_v0  ;;  %v58_v3 = vld [vmem:[#allocation5 + $0x68] sm:$0xff]  ;;  %v57_v4 = vld [vmem:[#allocation5 + $0x60] sm:$0xff]  ;;  %v56_v5 = vld [vmem:[#allocation5 + $0x58] sm:$0xff]  ;;  %s421_s29 = smov 32   ;;  %s422_s30 = smov 96   ;;  %vm147_vm1 = vcmask 261120  }
  0x1c   :  { %290 = vmatpush3.msra.mxu0 %v60_v1  ;;  %v55_v6 = vld [vmem:[#allocation5 + $0x50] sm:$0xff]  ;;  %v54_v7 = vld [vmem:[#allocation5 + $0x48] sm:$0xff]  ;;  %v53_v8 = vld [vmem:[#allocation5 + $0x40] sm:$0xff]  ;;  %s423_s5 = smov 64   ;;  %v424_v32 = vmov 1   ;;  %v425_v33 = vmov 0  }
  0x1d   :  { %291 = vmatprep.subr.mxu0 %v419_v0  ;;  %v52_v9 = vld [vmem:[#allocation5 + $0x38] sm:$0xff]  ;;  %v51_v10 = vld [vmem:[#allocation5 + $0x30] sm:$0xff]  ;;  %v50_v11 = vld [vmem:[#allocation5 + $0x28] sm:$0xff]  ;;  %339 = vset.pattern.permute.xlu1 %v424_v32  ;;  %vm170_vm2 = vcmask 7168   ;;  %vm172_vm3 = vcmask 15360   ;;  %vm174_vm4 = vcmask 23552  }
  0x1e   :  { %292 = vmatpush3.msra.mxu0 %v59_v2  ;;  %v49_v12 = vld [vmem:[#allocation5 + $0x20] sm:$0xff]  ;;  %v48_v13 = vld [vmem:[#allocation5 + $0x18] sm:$0xff]  ;;  %v47_v14 = vld [vmem:[#allocation5 + $0x10] sm:$0xff]  ;;  %338 = vset.pattern.permute.xlu0 %v425_v33  ;;  %vm176_vm5 = vcmask 31744   ;;  %v426_v60 = vmov 2   ;;  %v427_v61 = vmov 3  }
  0x1f   :  { %293 = vmatprep.subr.mxu0 %v419_v0  ;;  %v46_v15 = vld [vmem:[#allocation5 + $0x8] sm:$0xff]  ;;  %v45_v16 = vld [vmem:[#allocation5] sm:$0xff]  ;;  %v460_v17 = vld [vmem:[#allocation2] sm:$0xff]  ;;  %vm214_vm6 = vcmask 523520   ;;  %vm227_vm7 = vcmask 785920   ;;  %vm240_vm8 = vcmask 1048320  }
  0x20   :  { %294 = vmatpush3.msra.mxu0 %v58_v3  ;;  %v270_v18 = vld [vmem:[%s486_s2] ss:$0 sm:$0xff]  ;;  %vm249_vm9 = vcmask 523264   ;;  %s428_s2 = smov [#allocation7]   ;;  %vm251_vm10 = vcmask 785408  }
  0x21   :  { %295 = vmatprep.subr.mxu0 %v419_v0  ;;  %v271_v22 = vld [vmem:[%s487_s3] ss:$0 sm:$0xff]  ;;  %s260_s3 = sshll.u32 %s428_s2, 4  ;;  %s261_s3 = int_to_ptr.vmem [resolvable:$true] %s260_s3 }
  0x22   :  { %296 = vmatpush3.msra.mxu0 %v57_v4  ;;  %s389_s6 = scalar_lea.vmem %s261_s3, 16  ;;  %s393_s7 = scalar_lea.vmem %s261_s3, 32 }
  0x23   :  { %297 = vmatprep.subr.mxu0 %v419_v0  ;;  %p390_p10 = scmp.ne.s32.totalorder %s261_s3, %s389_s6  ;;  %p394_p11 = scmp.lt.s32.totalorder %s261_s3, %s261_s3 }
  0x24   :  { %298 = vmatpush3.msra.mxu0 %v56_v5  ;;  %p395_p12 = scmp.lt.s32.totalorder %s393_s7, %s389_s6 }
  0x25   :  { %299 = vmatprep.subr.mxu0 %v419_v0 }
  0x26   :  { %300 = vmatpush3.msra.mxu0 %v55_v6  ;;  %p396_p13 = por %p395_p12, %p394_p11 }
  0x27   :  { %301 = vmatprep.subr.mxu0 %v419_v0 }
  0x28   :  { %302 = vmatpush3.msra.mxu0 %v54_v7  ;;  %p397_p0 = pnand %p396_p13, %p390_p10 }
  0x29   :  { %303 = vmatprep.subr.mxu0 %v419_v0 }
  0x2a   :  { %304 = vmatpush3.msra.mxu0 %v53_v8 }
  0x2b   :  { %305 = vmatprep.subr.mxu0 %v419_v0 }
  0x2c   :  { %306 = vmatpush3.msra.mxu0 %v52_v9 }
  0x2d   :  { %307 = vmatprep.subr.mxu0 %v419_v0 }
  0x2e   :  { %308 = vmatpush3.msra.mxu0 %v51_v10 }
  0x2f   :  { %309 = vmatprep.subr.mxu0 %v419_v0 }
  0x30   :  { %310 = vmatpush3.msra.mxu0 %v50_v11 }
  0x31   :  { %311 = vmatprep.subr.mxu0 %v419_v0 }
  0x32   :  { %312 = vmatpush3.msra.mxu0 %v49_v12 }
  0x33   :  { %313 = vmatprep.subr.mxu0 %v419_v0 }
  0x34   :  { %314 = vmatpush3.msra.mxu0 %v48_v13 }
  0x35   :  { %315 = vmatprep.subr.mxu0 %v419_v0 }
  0x36   :  { %316 = vmatpush3.msra.mxu0 %v47_v14 }
  0x37   :  { %317 = vmatprep.subr.mxu0 %v419_v0 }
  0x38   :  { %318 = vmatpush3.msra.mxu0 %v46_v15 }
  0x39   :  { %319 = vmatprep.subr.mxu0 %v419_v0 }
  0x3a   :  { %320 = vmatpush3.msra.mxu0 %v45_v16 }
  0x3b   :  { %322 = vmatmul.mubr.f32.vlgmr.msra.gmra.mxu0 %v460_v17 }
  0xfb   :  { %v134_v19 = vpop.f32.mrf.mxu0 }
  0xfc   :  { %v135_v20 = vadd.f32 %v270_v18, %v134_v19 }
  0xfd   :  { %v323_v21 = vpop.f32.mrf.mxu0 }
  0xfe   :  { %343 = vtanh.f32 %v135_v20 }
 0x10b   :  { %v344_v23 = vpop.eup %343 }
 0x10c   :  { %v146_v24 = vmul.f32 %v344_v23, %v271_v22 }
 0x10e   :  { %164 = vrot.lane.b32.xlu1 %v146_v24, %s421_s29  ;;  %152 = vrot.lane.b32.xlu0 %v146_v24, %s422_s30  ;;  %v148_v25 = vsel %vm147_vm1, %v146_v24, 0.0 }
 0x112   :  { %158 = vrot.lane.b32.xlu0 %v146_v24, %s423_s5 }
 0x132   :  { %149 = vadd.xlane.f32.xlu1 %v148_v25 }
 0x180   :  { %v165_v26 = vpop.permute.xlu1 %164  ;;  %v153_v27 = vpop.permute.xlu0 %152 }
 0x181   :  { %v155_v28 = vsel %vm147_vm1, %v153_v27, 0.0  ;;  %v167_v29 = vsel %vm147_vm1, %v165_v26, 0.0 }
 0x182   :  { %156 = vadd.xlane.f32.xlu0 %v155_v28  ;;  %168 = vadd.xlane.f32.xlu1 %v167_v29 }
 0x184   :  { %v159_v30 = vpop.permute.xlu0 %158 }
 0x185   :  { %v161_v31 = vsel %vm147_vm1, %v159_v30, 0.0 }
 0x186   :  { %162 = vadd.xlane.f32.xlu0 %v161_v31 }
 0x1bb   :  { %v150_v35 = vpop.xlane.xlu1 %149 }
 0x20b   :  { %v157_v34 = vpop.xlane.xlu0 %156  ;;  %v169_v38 = vpop.xlane.xlu1 %168 }
 0x20c   :  { %v171_v36 = vsel %vm170_vm2, %v150_v35, %v157_v34 }
 0x20f   :  { %v163_v37 = vpop.xlane.xlu0 %162 }
 0x210   :  { %v173_v39 = vsel %vm172_vm3, %v171_v36, %v163_v37 }
 0x211   :  { %v175_v40 = vsel %vm174_vm4, %v173_v39, %v169_v38 }
 0x212   :  { %v177_v41 = vsel %vm176_vm5, %v175_v40, -inf }
 0x213   :  { %v178_v42 = vrot.slane %v177_v41, 4 }
 0x215   :  { %v179_v43 = vmax.f32 %v177_v41, %v178_v42 }
 0x217   :  { %v180_v44 = vrot.slane %v179_v43, 2 }
 0x219   :  { %v181_v45 = vmax.f32 %v179_v43, %v180_v44 }
 0x21b   :  { %v182_v46 = vrot.slane %v181_v45, 1 }
 0x21d   :  { %v183_v47 = vmax.f32 %v181_v45, %v182_v46 }
 0x21f   :  { %v184_v48 = vsub.f32 %v175_v40, %v183_v47 }
 0x221   :  { %v185_v49 = vmul.f32 1.442695, %v184_v48 }
 0x223   :  { %345 = vpow2.f32 %v185_v49 }
 0x230   :  { %v346_v50 = vpop.eup %345 }
 0x231   :  { %v187_v51 = vsel %vm176_vm5, %v346_v50, 0.0 }
 0x232   :  { %v188_v52 = vrot.slane %v187_v51, 4 }
 0x234   :  { %v189_v53 = vadd.f32 %v188_v52, %v187_v51 }
 0x236   :  { %v190_v54 = vrot.slane %v189_v53, 2 }
 0x238   :  { %v191_v55 = vadd.f32 %v190_v54, %v189_v53 }
 0x23a   :  { %v192_v56 = vrot.slane %v191_v55, 1 }
 0x23c   :  { %v193_v57 = vadd.f32 %v192_v56, %v191_v55 }
 0x23e   :  { %347 = vrcp.f32 %v193_v57 }
 0x24b   :  { %v348_v58 = vpop.eup %347 }
 0x24c   :  { %v195_v59 = vmul.f32 %v348_v58, %v346_v50 }
 0x24e   :  { %210 = vperm.xlu1 %339, %v195_v59   ;;  %198 = vperm.xlu0 %338, %v195_v59  }
 0x252   :  { %340 = vset.pattern.permute.xlu1 %v426_v60  ;;  %342 = vset.pattern.permute.xlu0 %v427_v61 }
 0x253   :  { %223 = vperm.xlu1 %340, %v195_v59  }
 0x257   :  { %341 = vset.pattern.permute.xlu1 %v427_v61 }
 0x258   :  { %236 = vperm.xlu1 %341, %v195_v59  }
 0x2c9   :  { %v211_v62 = vpop.permute.xlu1 %210  ;;  %v199_v63 = vpop.permute.xlu0 %198 }
 0x2ca   :  { %v213_v0 = vmul.f32 %v211_v62, %v460_v17  ;;  %v201_v1 = vmul.f32 %v199_v63, %v460_v17 }
 0x2cc   :  { %v215_v2 = vsel %vm214_vm6, %v213_v0, 0.0  ;;  %v202_v3 = vsel %vm147_vm1, %v201_v1, 0.0 }
 0x2cd   :  { %v216_v4 = vrot.slane %v215_v2, 4  ;;  %v203_v5 = vrot.slane %v202_v3, 4 }
 0x2ce   :  { %v224_v6 = vpop.permute.xlu1 %223 }
 0x2cf   :  { %v217_v7 = vadd.f32 %v216_v4, %v215_v2  ;;  %v204_v8 = vadd.f32 %v203_v5, %v202_v3  ;;  %v226_v9 = vmul.f32 %v224_v6, %v460_v17 }
 0x2d1   :  { %v218_v10 = vrot.slane %v217_v7, 2  ;;  %v205_v11 = vrot.slane %v204_v8, 2  ;;  %v228_v12 = vsel %vm227_vm7, %v226_v9, 0.0 }
 0x2d2   :  { %v229_v13 = vrot.slane %v228_v12, 4 }
 0x2d3   :  { %v237_v14 = vpop.permute.xlu1 %236  ;;  %v219_v18 = vadd.f32 %v218_v10, %v217_v7  ;;  %v206_v19 = vadd.f32 %v205_v11, %v204_v8 }
 0x2d4   :  { %v230_v15 = vadd.f32 %v229_v13, %v228_v12  ;;  %v239_v16 = vmul.f32 %v237_v14, %v460_v17 }
 0x2d5   :  { %v220_v24 = vrot.slane %v219_v18, 1  ;;  %v207_v25 = vrot.slane %v206_v19, 1 }
 0x2d6   :  { %v231_v20 = vrot.slane %v230_v15, 2  ;;  %v241_v21 = vsel %vm240_vm8, %v239_v16, 0.0 }
 0x2d7   :  { %v242_v22 = vrot.slane %v241_v21, 4  ;;  %v221_v29 = vadd.f32 %v220_v24, %v219_v18  ;;  %v208_v30 = vadd.f32 %v207_v25, %v206_v19 }
 0x2d8   :  { %v232_v23 = vadd.f32 %v231_v20, %v230_v15 }
 0x2d9   :  { %v243_v26 = vadd.f32 %v242_v22, %v241_v21  ;;  %v248_v34 = vsel %vm147_vm1, %v208_v30, %v221_v29 }
 0x2da   :  { %v233_v27 = vrot.slane %v232_v23, 1 }
 0x2db   :  { %v244_v28 = vrot.slane %v243_v26, 2 }
 0x2dc   :  { %v234_v32 = vadd.f32 %v233_v27, %v232_v23 }
 0x2dd   :  { %v245_v31 = vadd.f32 %v244_v28, %v243_v26 }
 0x2de   :  { %v250_v35 = vsel %vm249_vm9, %v248_v34, %v234_v32 }
 0x2df   :  { %v246_v33 = vrot.slane %v245_v31, 1 }
 0x2e1   :  { %v247_v17 = vadd.f32 %v246_v33, %v245_v31 }
 0x2e3   :  { %v252_v36 = vsel %vm251_vm10, %v250_v35, %v247_v17 }
 0x2e4   :  { %253 = vst [vmem:[#allocation7] sm:$0x1] %v252_v36 }
 0x2e5   :  { %400 = shalt.err (!%p397_p0)
}
 0x2e6   :  { %263 = dma.vmem_to_hbm [thread:$0]  %s261_s3, 16, %s488_s4, [#allocation4]  }
 0x2e7   :  { %413 = dma.done.wait [#allocation4], 16  }
 0x2e8   :  { %414 = vsyncadd [#allocation4], 4294967280 }
 0x2e9   :  { %267 = vsyncpa [#allocation3], 1 }
 0x2ea   :  { %268 = vsyncpa [#allocation6], 1 }
 0x2eb   :  { %269 = vsyncpa [#allocation4], 1 }

</bundles_post_ra>
